<compile_context>
chip_gen: v6e
topology: v6e:2x2x1
jax: 0.10.0
libtpu: 0.0.40
codegen_flags: <defaults>
</compile_context>

<pallas_src>
import numpy as np
import jax
import jax.numpy as jnp
from jax.experimental import pallas as pl
from jax.experimental.pallas import tpu as pltpu


def _dma_copy_kernel(x_ref, o_ref, sem):
    # Single contiguous HBM->HBM DMA of the whole (contiguous) buffer.
    cp = pltpu.make_async_copy(x_ref, o_ref, sem)
    cp.start()
    cp.wait()


def _resolve_shape(shape, total):
    """Resolve a single -1 in the target shape (torch.view semantics)."""
    shape = list(shape)
    if -1 in shape:
        idx = shape.index(-1)
        rest = int(np.prod([s for i, s in enumerate(shape) if i != idx])) or 1
        shape[idx] = total // rest if rest else 0
    shape = tuple(int(s) for s in shape)
    assert int(np.prod(shape)) == total, "view shape incompatible with input size"
    return shape


def view_module(x, shape, force_kernel=False):
    """Pallas equivalent of ViewModule(shape)(x) == x.view(*shape).

    Primary path: metadata-only reshape (what torch .view actually is).
    If force_kernel=True, the data additionally flows through a Pallas kernel
    implemented as one HBM->HBM DMA (no VMEM round-trip, no tiled grid).
    """
    total = int(np.prod(x.shape))
    out_shape = _resolve_shape(shape, total)

    # Primary / fast path: pure metadata, no HBM traffic, no kernel launch.
    if not force_kernel or total == 0:
        return jnp.reshape(x, out_shape)

    itemsize = jnp.dtype(x.dtype).itemsize
    nbytes = total * itemsize

    # Metadata-only reshape to the target view shape; the kernel then copies
    # the contiguous buffer with a single DMA (same shape in and out).
    x2 = jnp.reshape(x, out_shape)

    return pl.pallas_call(
        _dma_copy_kernel,
        out_shape=jax.ShapeDtypeStruct(out_shape, x.dtype),
        in_specs=[pl.BlockSpec(memory_space=pl.ANY)],
        out_specs=pl.BlockSpec(memory_space=pl.ANY),
        scratch_shapes=[pltpu.SemaphoreType.DMA(())],
        cost_estimate=pl.CostEstimate(
            flops=0, transcendentals=0, bytes_accessed=2 * nbytes
        ),
    )(x2)


if __name__ == "__main__":
    key = jax.random.PRNGKey(0)
    # Small NCHW input, consistent with a conv-model intermediate.
    x = jax.random.normal(key, (2, 4, 16, 16), dtype=jnp.float32)

    # ViewModule((2, -1)): flatten channels+spatial -> (2, 1024)
    target_shape = (2, -1)
    y_ref = jnp.reshape(x, (2, 1024))

    # Default (production) path: metadata-only, no kernel launched.
    y_meta = jax.block_until_ready(view_module(x, target_shape))
    assert y_meta.shape == (2, 1024), y_meta.shape
    np.testing.assert_allclose(np.asarray(y_meta), np.asarray(y_ref), rtol=0, atol=0)

    # Kernel path: single HBM->HBM DMA copy (exercised once here).
    y_kern = jax.block_until_ready(view_module(x, target_shape, force_kernel=True))
    assert y_kern.shape == (2, 1024), y_kern.shape
    np.testing.assert_allclose(np.asarray(y_kern), np.asarray(y_ref), rtol=0, atol=0)

    print("KERNEL_OK")
</pallas_src>

<mosaic_0001>
module attributes {stable_mosaic.version = 11 : i64} {
  func.func @_dma_copy_kernel(%arg0: memref<2x1024xf32, #tpu.memory_space<any>>, %arg1: memref<2x1024xf32, #tpu.memory_space<any>>, %arg2: memref<!tpu.dma_semaphore, #tpu.memory_space<semaphore_mem>>) attributes {dimension_semantics = [], scalar_prefetch = 0 : i64, scratch_operands = 1 : i64, tpu.core_type = #tpu.core_type<tc>} {
    tpu.enqueue_dma source(%arg0 : memref<2x1024xf32, #tpu.memory_space<any>>) target(%arg1 : memref<2x1024xf32, #tpu.memory_space<any>>) target_semaphore(%arg2 : memref<!tpu.dma_semaphore, #tpu.memory_space<semaphore_mem>>)
    tpu.wait_dma2 semaphore(%arg2 : memref<!tpu.dma_semaphore, #tpu.memory_space<semaphore_mem>>) src(%arg0 : memref<2x1024xf32, #tpu.memory_space<any>>) dst(%arg1 : memref<2x1024xf32, #tpu.memory_space<any>>)
    return
  }
}

</mosaic_0001>

<bundles_post_ra>
// kernel: tpu_custom_call.1
= control target key start
LH: loop header
LB: loop body
LE: loop exit
PB: predicated region body
PF: predicated region fallthrough
CT: control target
= control target key end

     0   :  { %s29_s6 = smov [#allocation2]   ;;  %s30_s7 = smov 131072   ;;  %s48_s0 = inlined_call_operand.hbm [shape: f32[2,1024], index: 0, kind: input, shape index: {}]   ;;  %s49_s1 = inlined_call_operand.hbm [shape: f32[2,1024], index: 1, kind: output, shape index: {}]  }
   0x1   :  { %s31_s8 = smov 0  }
   0x2   :  { %12 = dma.general %s48_s0, 256, %s49_s1, %s29_s6, %s30_s7, [#allocation4], %s31_s8, 0  }
   0x3   :  { %27 = dma.done.wait [#allocation2], 256 }
   0x4   :  { %28 = vsyncadd [#allocation2], 4294967040 }
   0x5   :  { %17 = vsyncmov [#allocation2] }
   0x8   :  { %s18_s13 = vpop.sfrf %17 }
   0x9   :  { %p23_p0 = scmp.ne.s32.totalorder %s18_s13, 0 }
   0xb   :  { %22 = shalt.err (%p23_p0)  }

</bundles_post_ra>
